<compile_context>
chip_gen: v7x
topology: tpu7x:2x2x1
jax: 0.10.0
libtpu: 0.0.40
codegen_flags: <defaults>
</compile_context>

<pallas_src>
import functools

import jax
import jax.numpy as jnp
from jax.experimental import pallas as pl
from jax.experimental.pallas import tpu as pltpu


N_IN, H1, H2, H3, N_OUT = 41, 512, 128, 32, 5
N_PROJ = 64
PACK_W = 128      # lane-dense packed-output width: [predict(5) | z(32) | pad(91)]
TB_ALIGN = 16     # sublane tile (16 covers the bf16 (16,128) packed tile too)


def _round_up(x, m):
    return ((x + m - 1) // m) * m


def mlp_contrastive_kernel(
    x_ref,                 # (TB, 41)  compute_dtype
    w1_ref, b1_ref,        # (41, 512) compute_dtype, (1, 512) f32
    w2_ref, b2_ref,        # (512,128) compute_dtype, (1, 128) f32
    wh_ref, bh_ref,        # folded head: (128, 69) f32, (1, 69) f32
    wf2_ref, bf2_ref,      # (64, 32) f32, (1, 32) f32
    out_ref,               # packed (TB, 128): [predict(5) | z(32) | pad(91)]
):
    # Layer 1: 41 -> 512 (dominant FLOPs; bf16 MXU on the default path, f32 acc).
    h1 = jnp.dot(x_ref[...], w1_ref[...],
                 preferred_element_type=jnp.float32) + b1_ref[...]
    # Keep h1 in compute dtype after ReLU: halves the biggest temporary and
    # feeds the next matmul's bf16 MXU path directly.
    h1 = jnp.maximum(h1, 0.0).astype(w2_ref.dtype)

    # Layer 2: 512 -> 128.
    h2 = jnp.dot(h1, w2_ref[...],
                 preferred_element_type=jnp.float32) + b2_ref[...]
    h2 = jnp.maximum(h2, 0.0)

    # Folded head: relu(h2 @ (W3 @ [Wf1|Wc]) + (b3 @ [Wf1|Wc] + [bf1|bc])).
    # Both halves get the ReLU (fc1 output inside projection_head, classifier
    # output before being returned as `predict`).
    fused = jnp.dot(h2, wh_ref[...],
                    preferred_element_type=jnp.float32) + bh_ref[...]
    fused = jnp.maximum(fused, 0.0)
    p1 = fused[:, :N_PROJ]                    # relu(fc1(before_predict)), (TB, 64)
    pred = fused[:, N_PROJ:N_PROJ + N_OUT]    # relu(classifier(before_predict)), (TB, 5)

    # fc2: 64 -> 32 (no ReLU) -> z.
    z = jnp.dot(p1, wf2_ref[...],
                preferred_element_type=jnp.float32) + bf2_ref[...]

    # Lane-dense packed output slab: [predict | z | zeros] -> 128 lanes,
    # single unmasked store.
    tb = out_ref.shape[0]
    pad = jnp.zeros((tb, PACK_W - N_OUT - H3), jnp.float32)
    out_ref[...] = jnp.concatenate([pred, z, pad], axis=1).astype(out_ref.dtype)


def make_params(key):
    """Deterministic parameter init (PyTorch-Linear-like uniform bounds)."""
    def linear(key, fan_in, fan_out):
        kw, kb = jax.random.split(key)
        bound = 1.0 / jnp.sqrt(fan_in)
        w = jax.random.uniform(kw, (fan_in, fan_out), jnp.float32, -bound, bound)
        b = jax.random.uniform(kb, (1, fan_out), jnp.float32, -bound, bound)
        return w, b

    keys = jax.random.split(key, 6)
    w1, b1 = linear(keys[0], N_IN, H1)
    w2, b2 = linear(keys[1], H1, H2)
    w3, b3 = linear(keys[2], H2, H3)
    wf1, bf1 = linear(keys[3], H3, N_PROJ)
    wf2, bf2 = linear(keys[4], N_PROJ, H3)
    wc, bc = linear(keys[5], H3, N_OUT)
    return (w1, b1, w2, b2, w3, b3, wf1, bf1, wf2, bf2, wc, bc)


def mlp_forward(x, params, *, block_b=4096, compute_dtype=jnp.bfloat16):
    """Runs the MLP forward pass; returns (predict, z) as f32.

    compute_dtype=jnp.bfloat16 (default) uses bf16 on the MXU for the two
    dominant matmuls with f32 accumulation and a bf16 packed-output slab
    (halves the dominant HBM write stream on v5e/v6e).  Pass
    compute_dtype=jnp.float32 for a bit-accurate f32 path.
    """
    (w1, b1, w2, b2, w3, b3, wf1, bf1, wf2, bf2, wc, bc) = params
    B, F = x.shape
    assert F == N_IN

    # --- Wrapper-side algebra / casts (all cheap, done once under jit) -------
    # Fold layer 3 (no ReLU, never returned) into the two heads, in f32.
    wfc = jnp.concatenate([wf1, wc], axis=1)          # (32, 69)
    bfc = jnp.concatenate([bf1, bc], axis=1)          # (1, 69)
    wh = w3 @ wfc                                      # (128, 69)
    bh = b3 @ wfc + bfc                                # (1, 69)

    # Cast the dominant-matmul operands once, wrapper-side (no per-tile casts).
    x_c = x.astype(compute_dtype)
    w1_c = w1.astype(compute_dtype)
    w2_c = w2.astype(compute_dtype)

    out_dtype = jnp.float32 if compute_dtype == jnp.float32 else jnp.bfloat16

    # --- Batch tiling ---------------------------------------------------------
    # Cap the tile at ~ceil(B/2) so there are >=2 grid steps whenever possible
    # (lets v7x's 2 TensorCores both work); otherwise use block_b.
    target = max(TB_ALIGN, _round_up(pl.cdiv(B, 2), TB_ALIGN))
    tb = min(_round_up(block_b, TB_ALIGN), target)
    b_pad = _round_up(B, tb)
    if b_pad != B:
        x_c = jnp.pad(x_c, ((0, b_pad - B), (0, 0)))
    grid = (b_pad // tb,)

    weights = (w1_c, b1, w2_c, b2, wh, bh, wf2, bf2)

    def resident(a):
        # Constant index_map -> fetched once, VMEM-resident across batch tiles.
        # TODO(synk): pipeline_mode=pl.Buffered(1) would drop the pointless
        # double buffer for these (~0.4 MiB); omitted to keep compile simple.
        return pl.BlockSpec(a.shape, lambda i: (0, 0))

    in_specs = [pl.BlockSpec((tb, N_IN), lambda i: (i, 0))]
    in_specs += [resident(w) for w in weights]
    out_spec = pl.BlockSpec((tb, PACK_W), lambda i: (i, 0))

    def nbytes(a):
        return a.size * a.dtype.itemsize

    flops = 2 * b_pad * (N_IN * H1 + H1 * H2 + H2 * (N_PROJ + N_OUT)
                         + N_PROJ * H3)
    bytes_accessed = (nbytes(x_c)
                      + b_pad * PACK_W * jnp.dtype(out_dtype).itemsize
                      + sum(nbytes(w) for w in weights))
    cost = pl.CostEstimate(flops=flops, transcendentals=0,
                           bytes_accessed=bytes_accessed)

    packed = pl.pallas_call(
        mlp_contrastive_kernel,
        out_shape=jax.ShapeDtypeStruct((b_pad, PACK_W), out_dtype),
        grid=grid,
        in_specs=in_specs,
        out_specs=out_spec,
        compiler_params=pltpu.CompilerParams(
            dimension_semantics=("parallel",),
            # Big tiles need more than v5e's 16 MiB scoped default; 40 MiB fits
            # comfortably inside every generation's physical VMEM (v7x: 64 MiB).
            vmem_limit_bytes=40 * 1024 * 1024,
        ),
        cost_estimate=cost,
    )(x_c, *weights)

    predict = packed[:B, :N_OUT].astype(jnp.float32)
    z = packed[:B, N_OUT:N_OUT + H3].astype(jnp.float32)
    return predict, z


def mlp_forward_ref(x, params):
    """Plain-JAX reference for sanity checking."""
    (w1, b1, w2, b2, w3, b3, wf1, bf1, wf2, bf2, wc, bc) = params
    h1 = jnp.maximum(x @ w1 + b1, 0.0)
    h2 = jnp.maximum(h1 @ w2 + b2, 0.0)
    bp = h2 @ w3 + b3
    z = jnp.maximum(bp @ wf1 + bf1, 0.0) @ wf2 + bf2
    predict = jnp.maximum(bp @ wc + bc, 0.0)
    return predict, z


if __name__ == "__main__":
    key = jax.random.PRNGKey(0)
    k_params, k_x1, k_x2 = jax.random.split(key, 3)

    params = make_params(k_params)

    # Test 1: exact f32 path, batch a multiple of the sublane tile.
    batch = 8
    x = jax.random.normal(k_x1, (batch, N_IN), jnp.float32)
    predict_f32, z_f32 = mlp_forward(x, params, compute_dtype=jnp.float32)
    jax.block_until_ready((predict_f32, z_f32))
    predict_ref, z_ref = mlp_forward_ref(x, params)
    assert predict_f32.shape == (batch, N_OUT) and z_f32.shape == (batch, H3)
    assert jnp.allclose(predict_f32, predict_ref, atol=1e-4, rtol=1e-4)
    assert jnp.allclose(z_f32, z_ref, atol=1e-4, rtol=1e-4)

    # Test 2: ragged batch on the f32 path (exercises padding / output slicing).
    batch2 = 13
    x2 = jax.random.normal(k_x2, (batch2, N_IN), jnp.float32)
    predict2, z2 = mlp_forward(x2, params, compute_dtype=jnp.float32)
    jax.block_until_ready((predict2, z2))
    predict2_ref, z2_ref = mlp_forward_ref(x2, params)
    assert predict2.shape == (batch2, N_OUT) and z2.shape == (batch2, H3)
    assert jnp.allclose(predict2, predict2_ref, atol=1e-4, rtol=1e-4)
    assert jnp.allclose(z2, z2_ref, atol=1e-4, rtol=1e-4)

    # Test 3: default fast path (bf16 dominant matmuls, f32 accumulation,
    # bf16 packed output) — relaxed but meaningful tolerance.
    predict_bf, z_bf = mlp_forward(x, params)
    jax.block_until_ready((predict_bf, z_bf))
    assert predict_bf.shape == (batch, N_OUT) and z_bf.shape == (batch, H3)
    assert jnp.allclose(predict_bf, predict_ref, atol=5e-2, rtol=5e-2)
    assert jnp.allclose(z_bf, z_ref, atol=5e-2, rtol=5e-2)

    print("KERNEL_OK")
</pallas_src>

<mosaic_0001>
module attributes {stable_mosaic.version = 11 : i64} {
  func.func @mlp_contrastive_kernel(%arg0: i32, %arg1: memref<16x41xf32, #tpu.memory_space<vmem>>, %arg2: memref<41x512xf32, #tpu.memory_space<vmem>>, %arg3: memref<1x512xf32, #tpu.memory_space<vmem>>, %arg4: memref<512x128xf32, #tpu.memory_space<vmem>>, %arg5: memref<1x128xf32, #tpu.memory_space<vmem>>, %arg6: memref<128x69xf32, #tpu.memory_space<vmem>>, %arg7: memref<1x69xf32, #tpu.memory_space<vmem>>, %arg8: memref<64x32xf32, #tpu.memory_space<vmem>>, %arg9: memref<1x32xf32, #tpu.memory_space<vmem>>, %arg10: memref<16x128xf32, #tpu.memory_space<vmem>>) attributes {dimension_semantics = [#tpu.dimension_semantics<parallel>], iteration_bounds = array<i64: 1>, scalar_prefetch = 0 : i64, scratch_operands = 0 : i64, tpu.core_type = #tpu.core_type<tc>, window_params = [{transform_indices = @transform_0, window_bounds = array<i64: 16, 41>}, {pipeline_mode = #tpu.pipeline_mode<synchronous>, transform_indices = @transform_1, window_bounds = array<i64: 41, 512>}, {pipeline_mode = #tpu.pipeline_mode<synchronous>, transform_indices = @transform_2, window_bounds = array<i64: 1, 512>}, {pipeline_mode = #tpu.pipeline_mode<synchronous>, transform_indices = @transform_3, window_bounds = array<i64: 512, 128>}, {pipeline_mode = #tpu.pipeline_mode<synchronous>, transform_indices = @transform_4, window_bounds = array<i64: 1, 128>}, {pipeline_mode = #tpu.pipeline_mode<synchronous>, transform_indices = @transform_5, window_bounds = array<i64: 128, 69>}, {pipeline_mode = #tpu.pipeline_mode<synchronous>, transform_indices = @transform_6, window_bounds = array<i64: 1, 69>}, {pipeline_mode = #tpu.pipeline_mode<synchronous>, transform_indices = @transform_7, window_bounds = array<i64: 64, 32>}, {pipeline_mode = #tpu.pipeline_mode<synchronous>, transform_indices = @transform_8, window_bounds = array<i64: 1, 32>}, {transform_indices = @transform_9, window_bounds = array<i64: 16, 128>}]} {
    %c0 = arith.constant 0 : index
    %c0_0 = arith.constant 0 : index
    %0 = vector.load %arg1[%c0, %c0_0] : memref<16x41xf32, #tpu.memory_space<vmem>>, vector<16x41xf32>
    %c0_1 = arith.constant 0 : index
    %c0_2 = arith.constant 0 : index
    %1 = vector.load %arg2[%c0_1, %c0_2] : memref<41x512xf32, #tpu.memory_space<vmem>>, vector<41x512xf32>
    %cst = arith.constant dense<0.000000e+00> : vector<16x512xf32>
    %2 = tpu.matmul %0, %1, %cst {dimension_numbers = #tpu.dot_dimension_numbers<[1], [0], [0], [1], [0, 0, 1, 1], [], []>} : vector<16x41xf32>, vector<41x512xf32>, vector<16x512xf32> -> vector<16x512xf32>
    %c0_3 = arith.constant 0 : index
    %c0_4 = arith.constant 0 : index
    %3 = vector.load %arg3[%c0_3, %c0_4] : memref<1x512xf32, #tpu.memory_space<vmem>>, vector<1x512xf32>
    %4 = vector.broadcast %3 : vector<1x512xf32> to vector<16x512xf32>
    %5 = arith.addf %2, %4 : vector<16x512xf32>
    %cst_5 = arith.constant 0.000000e+00 : f32
    %6 = vector.broadcast %cst_5 : f32 to vector<16x512xf32>
    %7 = arith.maximumf %5, %6 : vector<16x512xf32>
    %c0_6 = arith.constant 0 : index
    %c0_7 = arith.constant 0 : index
    %8 = vector.load %arg4[%c0_6, %c0_7] : memref<512x128xf32, #tpu.memory_space<vmem>>, vector<512x128xf32>
    %cst_8 = arith.constant dense<0.000000e+00> : vector<16x128xf32>
    %9 = tpu.matmul %7, %8, %cst_8 {dimension_numbers = #tpu.dot_dimension_numbers<[1], [0], [0], [1], [0, 0, 1, 1], [], []>} : vector<16x512xf32>, vector<512x128xf32>, vector<16x128xf32> -> vector<16x128xf32>
    %c0_9 = arith.constant 0 : index
    %c0_10 = arith.constant 0 : index
    %10 = vector.load %arg5[%c0_9, %c0_10] : memref<1x128xf32, #tpu.memory_space<vmem>>, vector<1x128xf32>
    %11 = vector.broadcast %10 : vector<1x128xf32> to vector<16x128xf32>
    %12 = arith.addf %9, %11 : vector<16x128xf32>
    %cst_11 = arith.constant 0.000000e+00 : f32
    %13 = vector.broadcast %cst_11 : f32 to vector<16x128xf32>
    %14 = arith.maximumf %12, %13 : vector<16x128xf32>
    %c0_12 = arith.constant 0 : index
    %c0_13 = arith.constant 0 : index
    %15 = vector.load %arg6[%c0_12, %c0_13] : memref<128x69xf32, #tpu.memory_space<vmem>>, vector<128x69xf32>
    %cst_14 = arith.constant dense<0.000000e+00> : vector<16x69xf32>
    %16 = tpu.matmul %14, %15, %cst_14 {dimension_numbers = #tpu.dot_dimension_numbers<[1], [0], [0], [1], [0, 0, 1, 1], [], []>} : vector<16x128xf32>, vector<128x69xf32>, vector<16x69xf32> -> vector<16x69xf32>
    %c0_15 = arith.constant 0 : index
    %c0_16 = arith.constant 0 : index
    %17 = vector.load %arg7[%c0_15, %c0_16] : memref<1x69xf32, #tpu.memory_space<vmem>>, vector<1x69xf32>
    %18 = vector.broadcast %17 : vector<1x69xf32> to vector<16x69xf32>
    %19 = arith.addf %16, %18 : vector<16x69xf32>
    %cst_17 = arith.constant 0.000000e+00 : f32
    %20 = vector.broadcast %cst_17 : f32 to vector<16x69xf32>
    %21 = arith.maximumf %19, %20 : vector<16x69xf32>
    %22 = vector.extract_strided_slice %21 {offsets = [0, 0], sizes = [16, 64], strides = [1, 1]} : vector<16x69xf32> to vector<16x64xf32>
    %23 = vector.extract_strided_slice %21 {offsets = [0, 64], sizes = [16, 5], strides = [1, 1]} : vector<16x69xf32> to vector<16x5xf32>
    %c0_18 = arith.constant 0 : index
    %c0_19 = arith.constant 0 : index
    %24 = vector.load %arg8[%c0_18, %c0_19] : memref<64x32xf32, #tpu.memory_space<vmem>>, vector<64x32xf32>
    %cst_20 = arith.constant dense<0.000000e+00> : vector<16x32xf32>
    %25 = tpu.matmul %22, %24, %cst_20 {dimension_numbers = #tpu.dot_dimension_numbers<[1], [0], [0], [1], [0, 0, 1, 1], [], []>} : vector<16x64xf32>, vector<64x32xf32>, vector<16x32xf32> -> vector<16x32xf32>
    %c0_21 = arith.constant 0 : index
    %c0_22 = arith.constant 0 : index
    %26 = vector.load %arg9[%c0_21, %c0_22] : memref<1x32xf32, #tpu.memory_space<vmem>>, vector<1x32xf32>
    %27 = vector.broadcast %26 : vector<1x32xf32> to vector<16x32xf32>
    %28 = arith.addf %25, %27 : vector<16x32xf32>
    %cst_23 = arith.constant 0.000000e+00 : f32
    %29 = vector.broadcast %cst_23 : f32 to vector<16x91xf32>
    %30 = tpu.concatenate %23, %28, %29 in 1 : vector<16x5xf32>, vector<16x32xf32>, vector<16x91xf32> -> vector<16x128xf32>
    %c0_24 = arith.constant 0 : index
    %c0_25 = arith.constant 0 : index
    %31 = vector.load %arg10[%c0_24, %c0_25] : memref<16x128xf32, #tpu.memory_space<vmem>>, vector<16x128xf32>
    tpu.vector_store %arg10[%c0_24, %c0_25], %30 {strides = array<i32>} : memref<16x128xf32, #tpu.memory_space<vmem>>, vector<16x128xf32>,
    return
  }
  func.func @transform_0(%arg0: i32) -> (i32, i32) {
    %c0_i32 = arith.constant 0 : i32
    %c0_i32_0 = arith.constant 0 : i32
    return %arg0, %c0_i32 : i32, i32
  }
  func.func @transform_1(%arg0: i32) -> (i32, i32) {
    %c0_i32 = arith.constant 0 : i32
    %c0_i32_0 = arith.constant 0 : i32
    %c0_i32_1 = arith.constant 0 : i32
    return %c0_i32, %c0_i32_0 : i32, i32
  }
  func.func @transform_2(%arg0: i32) -> (i32, i32) {
    %c0_i32 = arith.constant 0 : i32
    %c0_i32_0 = arith.constant 0 : i32
    %c0_i32_1 = arith.constant 0 : i32
    return %c0_i32, %c0_i32_0 : i32, i32
  }
  func.func @transform_3(%arg0: i32) -> (i32, i32) {
    %c0_i32 = arith.constant 0 : i32
    %c0_i32_0 = arith.constant 0 : i32
    %c0_i32_1 = arith.constant 0 : i32
    return %c0_i32, %c0_i32_0 : i32, i32
  }
  func.func @transform_4(%arg0: i32) -> (i32, i32) {
    %c0_i32 = arith.constant 0 : i32
    %c0_i32_0 = arith.constant 0 : i32
    %c0_i32_1 = arith.constant 0 : i32
    return %c0_i32, %c0_i32_0 : i32, i32
  }
  func.func @transform_5(%arg0: i32) -> (i32, i32) {
    %c0_i32 = arith.constant 0 : i32
    %c0_i32_0 = arith.constant 0 : i32
    %c0_i32_1 = arith.constant 0 : i32
    return %c0_i32, %c0_i32_0 : i32, i32
  }
  func.func @transform_6(%arg0: i32) -> (i32, i32) {
    %c0_i32 = arith.constant 0 : i32
    %c0_i32_0 = arith.constant 0 : i32
    %c0_i32_1 = arith.constant 0 : i32
    return %c0_i32, %c0_i32_0 : i32, i32
  }
  func.func @transform_7(%arg0: i32) -> (i32, i32) {
    %c0_i32 = arith.constant 0 : i32
    %c0_i32_0 = arith.constant 0 : i32
    %c0_i32_1 = arith.constant 0 : i32
    return %c0_i32, %c0_i32_0 : i32, i32
  }
  func.func @transform_8(%arg0: i32) -> (i32, i32) {
    %c0_i32 = arith.constant 0 : i32
    %c0_i32_0 = arith.constant 0 : i32
    %c0_i32_1 = arith.constant 0 : i32
    return %c0_i32, %c0_i32_0 : i32, i32
  }
  func.func @transform_9(%arg0: i32) -> (i32, i32) {
    %c0_i32 = arith.constant 0 : i32
    %c0_i32_0 = arith.constant 0 : i32
    return %arg0, %c0_i32 : i32, i32
  }
}

</mosaic_0001>

<bundles_post_ra>
// kernel: tpu_custom_call.1
= control target key start
LH: loop header
LB: loop body
LE: loop exit
PB: predicated region body
PF: predicated region fallthrough
CT: control target
= control target key end

     0   :  { %14 = vsyncpa [#allocation3], 0  ;;  %s1381_s0 = inlined_call_operand.vmem [shape: f32[16,41], index: 0, kind: input, shape index: {}]   ;;  %s1382_s1 = inlined_call_operand.vmem [shape: f32[41,512], index: 1, kind: input, shape index: {}]   ;;  %s1383_s2 = inlined_call_operand.vmem [shape: f32[1,512], index: 2, kind: input, shape index: {}]   ;;  %s1384_s3 = inlined_call_operand.hbm [shape: f32[512,128], index: 3, kind: input, shape index: {}]   ;;  %s1385_s4 = inlined_call_operand.vmem [shape: f32[1,128], index: 4, kind: input, shape index: {}]   ;;  %s1386_s5 = inlined_call_operand.vmem [shape: f32[128,69], index: 5, kind: input, shape index: {}]   ;;  %s1387_s6 = inlined_call_operand.vmem [shape: f32[1,69], index: 6, kind: input, shape index: {}]   ;;  %s1388_s7 = inlined_call_operand.vmem [shape: f32[64,32], index: 7, kind: input, shape index: {}]   ;;  %s1389_s8 = inlined_call_operand.vmem [shape: f32[1,32], index: 8, kind: input, shape index: {}]   ;;  %s1390_s9 = inlined_call_operand.hbm [shape: f32[16,128], index: 9, kind: output, shape index: {}]  }
   0x1   :  { %15 = vsyncpa [#allocation4], 0  ;;  %s1103_s30 = smov [#allocation2]   ;;  %s1055_s13 = scalar_lea.hbm %s1384_s3, 8192 }
   0x2   :  { %s27_s10 = sshll.u32 %s1103_s30, 4  ;;  %p1056_p0 = scmp.ne.s32.totalorder %s1384_s3, %s1055_s13  ;;  %s28_s10 = int_to_ptr.vmem [resolvable:$true] %s27_s10 }
   0x3   :  { %p1059_p1 = scmp.lt.u32.totalorder %s1055_s13, %s1384_s3 }
   0x5   :  { %p1061_p2 = pnand %p1059_p1, %p1056_p0 }
   0x7   :  { %1064 = shalt.err (!%p1061_p2)
}
   0x8   :  { %s1065_s18 = scalar_lea.vmem %s28_s10, 8192  ;;  %p1070_p4 = scmp.lt.s32.totalorder %s28_s10, %s28_s10 }
   0x9   :  { %p1066_p3 = scmp.ne.s32.totalorder %s28_s10, %s1065_s18  ;;  %p1071_p5 = scmp.lt.s32.totalorder %s1065_s18, %s1065_s18 }
   0xb   :  { %p1072_p6 = por %p1071_p5, %p1070_p4 }
   0xd   :  { %p1073_p7 = pnand %p1072_p6, %p1066_p3 }
   0xf   :  { %1076 = shalt.err (!%p1073_p7)
}
  0x10   :  { %s1104_s19 = smov 128   ;;  %s1105_s20 = smov 8  }
  0x11   :  { %33 = dma.hbm_to_vmem [thread:$0]  %s1384_s3, 8192, %s28_s10, [#allocation3], %s1104_s19, %s1104_s19, %s1105_s20  }
  0x12   :  { %1099 = dma.done.wait [#allocation3], 8192  }
  0x13   :  { %1100 = vsyncadd [#allocation3], 4294959104  ;;  %v1106_v0 = vmov 0.0   ;;  %v50_v1 = vld [vmem:[%s1382_s1 + $0x8] sm:$0xff]  ;;  %v49_v3 = vld [vmem:[%s1382_s1] sm:$0xff]  ;;  %vm102_vm0 = vcmask 1040384  }
  0x14   :  { %179 = vmatprep.mubr.f32.mxu1 %v1106_v0  ;;  %v54_v2 = vld [vmem:[%s1382_s1 + $0x28] sm:$0xff]  ;;  %v53_v5 = vld [vmem:[%s1382_s1 + $0x20] sm:$0xff]  ;;  %vm1107_vm1 = vmmov 1   ;;  %v52_v19 = vld [vmem:[%s1382_s1 + $0x18] sm:$0xff]  ;;  %vm95_vm3 = vcmask 334848   ;;  %vm615_vm4 = vcmask 523264  }
  0x15   :  { %v907_v4 = vpack.c.bf16 %v54_v2, %v50_v1  ;;  %v58_v6 = vld [vmem:[%s1382_s1 + $0x48] sm:$0xff]  ;;  %v909_v8 = vpack.c.bf16 %v53_v5, %v49_v3  ;;  %v57_v10 = vld [vmem:[%s1382_s1 + $0x40] sm:$0xff]  ;;  %vm1213_vm2 = vmpackc.low %vm102_vm0, %vm1107_vm1  ;;  %s1108_s17 = smov 64   ;;  %vm711_vm5 = vcmask 39936   ;;  %vm714_vm6 = vcmask 302080   ;;  %s1110_s21 = smov [#allocation5]  }
  0x16   :  { %v62_v7 = vld [vmem:[%s1382_s1 + $0x68] sm:$0xff]  ;;  %v61_v11 = vld [vmem:[%s1382_s1 + $0x60] sm:$0xff]  ;;  %v56_v20 = vld [vmem:[%s1382_s1 + $0x38] sm:$0xff]  ;;  %s724_s22 = sshll.u32 %s1110_s21, 4  ;;  %s725_s22 = int_to_ptr.vmem [resolvable:$true] %s724_s22 }
  0x17   :  { %v911_v9 = vpack.c.bf16 %v62_v7, %v58_v6  ;;  %v66_v12 = vld [vmem:[%s1382_s1 + $0x88] sm:$0xff]  ;;  %908 = vmatprep.subr.bf16.mxu1 %v907_v4  ;;  %v913_v14 = vpack.c.bf16 %v61_v11, %v57_v10  ;;  %v65_v16 = vld [vmem:[%s1382_s1 + $0x80] sm:$0xff]  ;;  %v51_v21 = vld [vmem:[%s1382_s1 + $0x10] sm:$0xff]  ;;  %v921_v27 = vpack.c.bf16 %v56_v20, %v52_v19  ;;  %p1082_p9 = scmp.lt.s32.totalorder %s725_s22, %s725_s22 }
  0x18   :  { %v70_v13 = vld [vmem:[%s1382_s1 + $0xa8] sm:$0x1]  ;;  %910 = vmatpush1.bf16.msra.mxu1 %v909_v8  ;;  %v69_v17 = vld [vmem:[%s1382_s1 + $0xa0] sm:$0x1]  ;;  %v55_v22 = vld [vmem:[%s1382_s1 + $0x30] sm:$0xff] }
  0x19   :  { %912 = vmatprep.subr.bf16.mxu1 %v911_v9  ;;  %v915_v15 = vpack.c.bf16 %v70_v13, %v66_v12  ;;  %v918_v23 = vpack.c.bf16 %v69_v17, %v65_v16  ;;  %v60_v24 = vld [vmem:[%s1382_s1 + $0x58] sm:$0xff]  ;;  %v293_v26 = vld [vmem:[#allocation2 + $0x80] sm:$0xff]  ;;  %v294_v28 = vld [vmem:[#allocation2 + $0x88] sm:$0xff]  ;;  %v923_v41 = vpack.c.bf16 %v55_v22, %v51_v21 }
  0x1a   :  { %v64_v25 = vld [vmem:[%s1382_s1 + $0x78] sm:$0xff]  ;;  %v277_v29 = vld [vmem:[#allocation2] sm:$0xff]  ;;  %v278_v30 = vld [vmem:[#allocation2 + $0x8] sm:$0xff]  ;;  %v935_v31 = vpack.c.bf16 %v294_v28, %v293_v26 }
  0x1b   :  { %v937_v32 = vpack.c.bf16 %v278_v30, %v277_v29  ;;  %v295_v33 = vld [vmem:[#allocation2 + $0x90] sm:$0xff]  ;;  %v296_v34 = vld [vmem:[#allocation2 + $0x98] sm:$0xff]  ;;  %v297_v38 = vld [vmem:[#allocation2 + $0xa0] sm:$0xff]  ;;  %v925_v42 = vpack.c.bf16 %v64_v25, %v60_v24 }
  0x1c   :  { %914 = vmatpush1.bf16.msra.mxu1 %v913_v14  ;;  %v279_v35 = vld [vmem:[#allocation2 + $0x10] sm:$0xff]  ;;  %v939_v36 = vpack.c.bf16 %v296_v34, %v295_v33  ;;  %v280_v37 = vld [vmem:[#allocation2 + $0x18] sm:$0xff]  ;;  %v298_v39 = vld [vmem:[#allocation2 + $0xa8] sm:$0xff]  ;;  %936 = vmatprep.subr.bf16.mxu0 %v935_v31 }
  0x1d   :  { %917 = vmatprep.subr.msk.bf16.mxu1 %vm1213_vm2, %v915_v15  ;;  %v1242_v40 = vld [vmem:[%s1381_s0] sm:$0xff]  ;;  %v59_v43 = vld [vmem:[%s1382_s1 + $0x50] sm:$0xff]  ;;  %v68_v45 = vld [vmem:[%s1382_s1 + $0x98] sm:$0xff]  ;;  %938 = vmatpush3.bf16.msra.mxu0 %v937_v32  ;;  %v941_v46 = vpack.c.bf16 %v280_v37, %v279_v35  ;;  %v943_v48 = vpack.c.bf16 %v298_v39, %v297_v38 }
  0x1e   :  { %v63_v44 = vld [vmem:[%s1382_s1 + $0x70] sm:$0xff]  ;;  %v72_v47 = vld [vmem:[%s1382_s1 + $0xb8] sm:$0x1]  ;;  %940 = vmatprep.subr.bf16.mxu0 %v939_v36  ;;  %v281_v49 = vld [vmem:[#allocation2 + $0x20] sm:$0xff] }
  0x1f   :  { %v282_v50 = vld [vmem:[#allocation2 + $0x28] sm:$0xff]  ;;  %v299_v51 = vld [vmem:[#allocation2 + $0xb0] sm:$0xff]  ;;  %v300_v52 = vld [vmem:[#allocation2 + $0xb8] sm:$0xff]  ;;  %v927_v54 = vpack.c.bf16 %v63_v44, %v59_v43  ;;  %v929_v55 = vpack.c.bf16 %v72_v47, %v68_v45 }
  0x20   :  { %920 = vmatpush1.bf16.msk.msra.mxu1 %vm1213_vm2, %v918_v23  ;;  %v1262_v53 = vld [vmem:[%s1381_s0 + $0x8] sm:$0xff]  ;;  %v67_v56 = vld [vmem:[%s1382_s1 + $0x90] sm:$0xff]  ;;  %v945_v58 = vpack.c.bf16 %v282_v50, %v281_v49  ;;  %v325_v59 = vld [vmem:[#allocation2 + $0x180] sm:$0xff]  ;;  %v947_v60 = vpack.c.bf16 %v300_v52, %v299_v51 }
  0x21   :  { %922 = vmatprep.subr.bf16.mxu1 %v921_v27  ;;  %v71_v57 = vld [vmem:[%s1382_s1 + $0xb0] sm:$0x1]  ;;  %942 = vmatpush3.bf16.msra.mxu0 %v941_v46  ;;  %v326_v61 = vld [vmem:[#allocation2 + $0x188] sm:$0xff]  ;;  %v284_v63 = vld [vmem:[#allocation2 + $0x38] sm:$0xff] }
  0x22   :  { %944 = vmatprep.subr.bf16.mxu0 %v943_v48  ;;  %v283_v62 = vld [vmem:[#allocation2 + $0x30] sm:$0xff]  ;;  %v301_v1 = vld [vmem:[#allocation2 + $0xc0] sm:$0xff]  ;;  %v302_v2 = vld [vmem:[#allocation2 + $0xc8] sm:$0xff]  ;;  %v932_v3 = vpack.c.bf16 %v71_v57, %v67_v56  ;;  %v967_v4 = vpack.c.bf16 %v326_v61, %v325_v59 }
  0x23   :  { %738 = vmatmul.mubr.msk.f32.vlgmr.msra.gmra.mrb[0].mxu1 %vm95_vm3, %v1242_v40  ;;  %v949_v5 = vpack.c.bf16 %v284_v63, %v283_v62  ;;  %v309_v6 = vld [vmem:[#allocation2 + $0x100] sm:$0xff]  ;;  %v310_v7 = vld [vmem:[#allocation2 + $0x108] sm:$0xff]  ;;  %v327_v8 = vld [vmem:[#allocation2 + $0x190] sm:$0xff]  ;;  %v951_v9 = vpack.c.bf16 %v302_v2, %v301_v1 }
  0x24   :  { %924 = vmatpush1.bf16.msra.mxu1 %v923_v41  ;;  %185 = vmatprep.mubr.f32.mxu1 %v1106_v0  ;;  %v328_v10 = vld [vmem:[#allocation2 + $0x198] sm:$0xff]  ;;  %v285_v11 = vld [vmem:[#allocation2 + $0x40] sm:$0xff]  ;;  %v286_v12 = vld [vmem:[#allocation2 + $0x48] sm:$0xff]  ;;  %v969_v15 = vpack.c.bf16 %v310_v7, %v309_v6 }
  0x25   :  { %926 = vmatprep.subr.bf16.mxu1 %v925_v42  ;;  %946 = vmatpush3.bf16.msra.mxu0 %v945_v58  ;;  %v303_v13 = vld [vmem:[#allocation2 + $0xd0] sm:$0xff]  ;;  %v304_v14 = vld [vmem:[#allocation2 + $0xd8] sm:$0xff]  ;;  %v971_v16 = vpack.c.bf16 %v328_v10, %v327_v8  ;;  %v953_v17 = vpack.c.bf16 %v286_v12, %v285_v11  ;;  %v329_v21 = vld [vmem:[#allocation2 + $0x1a0] sm:$0xff]  ;;  %v75_v12 = vlaneseq }
  0x26   :  { %948 = vmatprep.subr.bf16.mxu0 %v947_v60  ;;  %v311_v19 = vld [vmem:[#allocation2 + $0x110] sm:$0xff]  ;;  %v312_v20 = vld [vmem:[#allocation2 + $0x118] sm:$0xff]  ;;  %v955_v22 = vpack.c.bf16 %v304_v14, %v303_v13  ;;  %v330_v23 = vld [vmem:[#allocation2 + $0x1a8] sm:$0xff] }
  0x27   :  { %739 = vmatmul.mubr.msk.f32.gmra.mrb[2].mxu1 %vm95_vm3, %v1262_v53  ;;  %v287_v24 = vld [vmem:[#allocation2 + $0x50] sm:$0xff]  ;;  %v288_v25 = vld [vmem:[#allocation2 + $0x58] sm:$0xff]  ;;  %v305_v26 = vld [vmem:[#allocation2 + $0xe0] sm:$0xff]  ;;  %v973_v18 = vpack.c.bf16 %v312_v20, %v311_v19  ;;  %v975_v28 = vpack.c.bf16 %v330_v23, %v329_v21  ;;  %v76_v13 = vshrl.u32 %v75_v12, 7 }
  0x28   :  { %928 = vmatpush1.bf16.msra.mxu1 %v927_v54  ;;  %256 = vmatprep.mubr.f32.mxu1 %v1106_v0  ;;  %v306_v27 = vld [vmem:[#allocation2 + $0xe8] sm:$0xff]  ;;  %v957_v29 = vpack.c.bf16 %v288_v25, %v287_v24  ;;  %v313_v30 = vld [vmem:[#allocation2 + $0x120] sm:$0xff]  ;;  %v331_v33 = vld [vmem:[#allocation2 + $0x1b0] sm:$0xff] }
  0x29   :  { %931 = vmatprep.subr.msk.bf16.mxu1 %vm1213_vm2, %v929_v55  ;;  %950 = vmatpush3.bf16.msra.mxu0 %v949_v5  ;;  %v314_v31 = vld [vmem:[#allocation2 + $0x128] sm:$0xff]  ;;  %v959_v32 = vpack.c.bf16 %v306_v27, %v305_v26  ;;  %v332_v34 = vld [vmem:[#allocation2 + $0x1b8] sm:$0xff]  ;;  %v289_v36 = vld [vmem:[#allocation2 + $0x60] sm:$0xff]  ;;  %v77_v14 = vsub.s32 0, %v76_v13 }
  0x2a   :  { %952 = vmatprep.subr.bf16.mxu0 %v951_v9  ;;  %v977_v35 = vpack.c.bf16 %v314_v31, %v313_v30  ;;  %v290_v37 = vld [vmem:[#allocation2 + $0x68] sm:$0xff]  ;;  %v315_v38 = vld [vmem:[#allocation2 + $0x130] sm:$0xff]  ;;  %v308_v43 = vld [vmem:[#allocation2 + $0xf8] sm:$0xff]  ;;  %v85_v30 = vsub.s32 2, %v76_v13 }
  0x2b   :  { %v961_v39 = vpack.c.bf16 %v290_v37, %v289_v36  ;;  %v307_v42 = vld [vmem:[#allocation2 + $0xf0] sm:$0xff]  ;;  %v333_v44 = vld [vmem:[#allocation2 + $0x1c0] sm:$0xff]  ;;  %v334_v46 = vld [vmem:[#allocation2 + $0x1c8] sm:$0xff] }
  0x2c   :  { %934 = vmatpush1.bf16.msk.msra.mxu1 %vm1213_vm2, %v932_v3  ;;  %v963_v45 = vpack.c.bf16 %v308_v43, %v307_v42  ;;  %v291_v47 = vld [vmem:[#allocation2 + $0x70] sm:$0xff]  ;;  %v292_v48 = vld [vmem:[#allocation2 + $0x78] sm:$0xff]  ;;  %v983_v49 = vpack.c.bf16 %v334_v46, %v333_v44  ;;  %v317_v51 = vld [vmem:[#allocation2 + $0x140] sm:$0xff] }
  0x2d   :  { %968 = vmatprep.subr.bf16.mxu1 %v967_v4  ;;  %954 = vmatpush3.bf16.msra.mxu0 %v953_v17  ;;  %v965_v50 = vpack.c.bf16 %v292_v48, %v291_v47  ;;  %v318_v52 = vld [vmem:[#allocation2 + $0x148] sm:$0xff]  ;;  %v335_v54 = vld [vmem:[#allocation2 + $0x1d0] sm:$0xff]  ;;  %v336_v55 = vld [vmem:[#allocation2 + $0x1d8] sm:$0xff] }
  0x2e   :  { %956 = vmatprep.subr.bf16.mxu0 %v955_v22  ;;  %v987_v56 = vpack.c.bf16 %v336_v55, %v335_v54  ;;  %v319_v57 = vld [vmem:[#allocation2 + $0x150] sm:$0xff]  ;;  %v320_v58 = vld [vmem:[#allocation2 + $0x158] sm:$0xff]  ;;  %v337_v60 = vld [vmem:[#allocation2 + $0x1e0] sm:$0xff] }
  0x2f   :  { %742 = vmatmul.mubr.msk.f32.vlgmr.msra.gmra.mrb[4].mxu1 %vm95_vm3, %v1242_v40  ;;  %v316_v40 = vld [vmem:[#allocation2 + $0x138] sm:$0xff]  ;;  %v989_v59 = vpack.c.bf16 %v320_v58, %v319_v57  ;;  %v338_v61 = vld [vmem:[#allocation2 + $0x1e8] sm:$0xff]  ;;  %v321_v63 = vld [vmem:[#allocation2 + $0x160] sm:$0xff] }
  0x30   :  { %262 = vmatprep.mubr.f32.mxu1 %v1106_v0  ;;  %970 = vmatpush3.bf16.msra.mxu1 %v969_v15  ;;  %v979_v0 = vpack.c.bf16 %v332_v34, %v331_v33  ;;  %v981_v41 = vpack.c.bf16 %v316_v40, %v315_v38  ;;  %v991_v62 = vpack.c.bf16 %v338_v61, %v337_v60  ;;  %v322_v1 = vld [vmem:[#allocation2 + $0x168] sm:$0xff]  ;;  %v339_v3 = vld [vmem:[#allocation2 + $0x1f0] sm:$0xff]  ;;  %v340_v4 = vld [vmem:[#allocation2 + $0x1f8] sm:$0xff]  ;;  %v89_v33 = vsub.s32 3, %v76_v13 }
  0x31   :  { %972 = vmatprep.subr.bf16.mxu1 %v971_v16  ;;  %958 = vmatpush3.bf16.msra.mxu0 %v957_v29  ;;  %v993_v2 = vpack.c.bf16 %v322_v1, %v321_v63  ;;  %v995_v5 = vpack.c.bf16 %v340_v4, %v339_v3  ;;  %v323_v6 = vld [vmem:[#allocation2 + $0x170] sm:$0xff]  ;;  %v324_v7 = vld [vmem:[#allocation2 + $0x178] sm:$0xff]  ;;  %v500_v9 = vld [vmem:[%s1386_s5] sm:$0xff]  ;;  %v81_v16 = vsub.s32 1, %v76_v13 }
  0x32   :  { %960 = vmatprep.subr.bf16.mxu0 %v959_v32  ;;  %v997_v8 = vpack.c.bf16 %v324_v7, %v323_v6  ;;  %v501_v10 = vld [vmem:[%s1386_s5 + $0x8] sm:$0xff]  ;;  %v73_v15 = vld [vmem:[%s1383_s2] sm:$0xf]  ;;  %v502_v24 = vld [vmem:[%s1386_s5 + $0x10] sm:$0xff] }
  0x33   :  { %743 = vmatmul.mubr.msk.f32.gmra.mrb[6].mxu1 %vm95_vm3, %v1262_v53  ;;  %v985_v53 = vpack.c.bf16 %v318_v52, %v317_v51  ;;  %v999_v11 = vpack.c.bf16 %v501_v10, %v500_v9  ;;  %v78_v17 = vrot.slane %v73_v15, %v77_v14  ;;  %v82_v19 = vrot.slane %v73_v15, %v81_v16  ;;  %v503_v25 = vld [vmem:[%s1386_s5 + $0x18] sm:$0xff]  ;;  %v506_v52 = vld [vmem:[%s1386_s5 + $0x30] sm:$0xff]  ;;  %v508_v55 = vld [vmem:[%s1386_s5 + $0x40] sm:$0xff] }
  0x34   :  { %974 = vmatpush3.bf16.msra.mxu1 %v973_v18  ;;  %v1003_v31 = vpack.c.bf16 %v503_v25, %v502_v24  ;;  %v90_v36 = vrot.slane %v73_v15, %v89_v33  ;;  %v510_v58 = vld [vmem:[%s1386_s5 + $0x50] sm:$0xff]  ;;  %v512_v61 = vld [vmem:[%s1386_s5 + $0x60] sm:$0xff]  ;;  %v607_v33 = vld [vmem:[%s1388_s7 + $0x38] sm:$0xff] }
  0x35   :  { %976 = vmatprep.subr.bf16.mxu1 %v975_v28  ;;  %962 = vmatpush3.bf16.msra.mxu0 %v961_v39  ;;  %v514_v1 = vld [vmem:[%s1386_s5 + $0x70] sm:$0xff]  ;;  %v600_v4 = vld [vmem:[%s1388_s7] sm:$0xff] }
  0x36   :  { %964 = vmatprep.subr.bf16.mxu0 %v963_v45  ;;  %v602_v6 = vld [vmem:[%s1388_s7 + $0x10] sm:$0xff]  ;;  %v604_v10 = vld [vmem:[%s1388_s7 + $0x20] sm:$0xff] }
  0x38   :  { %978 = vmatpush3.bf16.msra.mxu1 %v977_v35 }
  0x39   :  { %980 = vmatprep.subr.bf16.mxu1 %v979_v0  ;;  %966 = vmatpush3.bf16.msra.mxu0 %v965_v50  ;;  %v86_v0 = vrot.slane %v73_v15, %v85_v30  ;;  %v505_v50 = vld [vmem:[%s1386_s5 + $0x28] sm:$0xff] }
  0x3a   :  { %1000 = vmatprep.subr.bf16.mxu0 %v999_v11 }
  0x3c   :  { %982 = vmatpush3.bf16.msra.mxu1 %v981_v41 }
  0x3d   :  { %984 = vmatprep.subr.bf16.mxu1 %v983_v49  ;;  %v504_v49 = vld [vmem:[%s1386_s5 + $0x20] sm:$0xff] }
  0x3e   :  { %v1007_v51 = vpack.c.bf16 %v505_v50, %v504_v49 }
  0x40   :  { %986 = vmatpush3.bf16.msra.mxu1 %v985_v53  ;;  %v507_v53 = vld [vmem:[%s1386_s5 + $0x38] sm:$0xff] }
  0x41   :  { %988 = vmatprep.subr.bf16.mxu1 %v987_v56  ;;  %v1011_v54 = vpack.c.bf16 %v507_v53, %v506_v52  ;;  %v509_v56 = vld [vmem:[%s1386_s5 + $0x48] sm:$0xff] }
  0x42   :  { %v1015_v57 = vpack.c.bf16 %v509_v56, %v508_v55 }
  0x44   :  { %990 = vmatpush3.bf16.msra.mxu1 %v989_v59  ;;  %v511_v59 = vld [vmem:[%s1386_s5 + $0x58] sm:$0xff] }
  0x45   :  { %992 = vmatprep.subr.bf16.mxu1 %v991_v62  ;;  %v1019_v60 = vpack.c.bf16 %v511_v59, %v510_v58  ;;  %v513_v62 = vld [vmem:[%s1386_s5 + $0x68] sm:$0xff] }
  0x46   :  { %v1023_v63 = vpack.c.bf16 %v513_v62, %v512_v61 }
  0x48   :  { %994 = vmatpush3.bf16.msra.mxu1 %v993_v2  ;;  %v515_v2 = vld [vmem:[%s1386_s5 + $0x78] sm:$0xff] }
  0x49   :  { %996 = vmatprep.subr.bf16.mxu1 %v995_v5  ;;  %v1027_v3 = vpack.c.bf16 %v515_v2, %v514_v1  ;;  %v601_v5 = vld [vmem:[%s1388_s7 + $0x8] sm:$0xff] }
  0x4a   :  { %v1031_v7 = vpack.c.bf16 %v601_v5, %v600_v4 }
  0x4c   :  { %998 = vmatpush3.bf16.msra.mxu1 %v997_v8  ;;  %v603_v8 = vld [vmem:[%s1388_s7 + $0x18] sm:$0xff] }
  0x4d   :  { %v1035_v9 = vpack.c.bf16 %v603_v8, %v602_v6  ;;  %1032 = vmatprep.subr.bf16.mxu1 %v1031_v7 }
  0xf6   :  { %v181_v20 = vpop.f32.mrb[0].mxu1 }
  0xf7   :  { %v182_v21 = vadd.f32 %v181_v20, %v78_v17  ;;  %v183_v22 = vpop.f32.mrb[1].mxu1  ;;  %v744_v20 = vld [vmem:[%s1385_s4] ss:$0 sm:$0xff] }
  0xf8   :  { %v184_v23 = vadd.f32 %v183_v22, %v82_v19 }
  0xf9   :  { %v269_v26 = vmax.f32 %v182_v21, 0.0 }
  0xfa   :  { %v187_v27 = vpop.f32.mrb[2].mxu1  ;;  %v270_v18 = vmax.f32 %v184_v23, 0.0 }
  0xfb   :  { %v188_v28 = vadd.f32 %v187_v27, %v78_v17  ;;  %v189_v29 = vpop.f32.mrb[3].mxu1 }
  0xfc   :  { %v190_v32 = vadd.f32 %v189_v29, %v82_v19  ;;  %412 = vmatprep.mubr.f32.mxu0 %v270_v18 }
  0xfd   :  { %v273_v34 = vmax.f32 %v188_v28, 0.0  ;;  %413 = vmatmul.mubr.f32.vlgmr.msra.gmra.mrb[0].mxu0 %v269_v26 }
  0xfe   :  { %v274_v35 = vmax.f32 %v190_v32, 0.0  ;;  %1002 = vmatpush3.bf16.msra.mxu0 %v999_v11  ;;  %v605_v11 = vld [vmem:[%s1388_s7 + $0x28] sm:$0xff]  ;;  %v606_v32 = vld [vmem:[%s1388_s7 + $0x30] sm:$0xff] }
  0xff   :  { %1004 = vmatprep.subr.bf16.mxu0 %v1003_v31  ;;  %v1039_v12 = vpack.c.bf16 %v605_v11, %v604_v10 }
 0x100   :  { %417 = vmatprep.mubr.f32.mxu0 %v274_v35  ;;  %v745_v35 = vld [vmem:[%s1387_s6] ss:$0 sm:$0xff]  ;;  %s1109_s6 = smov 5  }
 0x101   :  { %418 = vmatmul.mubr.f32.gmra.mrb[2].mxu0 %v273_v34  ;;  %v1043_v34 = vpack.c.bf16 %v607_v33, %v606_v32 }
 0x102   :  { %v258_v37 = vpop.f32.mrb[4].mxu1  ;;  %1006 = vmatpush3.bf16.msra.mxu0 %v1003_v31 }
 0x103   :  { %v259_v38 = vadd.f32 %v258_v37, %v86_v0  ;;  %v260_v39 = vpop.f32.mrb[5].mxu1  ;;  %1008 = vmatprep.subr.bf16.mxu0 %v1007_v51 }
 0x104   :  { %v261_v40 = vadd.f32 %v260_v39, %v90_v36 }
 0x105   :  { %v271_v43 = vmax.f32 %v259_v38, 0.0 }
 0x106   :  { %v272_v41 = vmax.f32 %v261_v40, 0.0  ;;  %v264_v42 = vpop.f32.mrb[6].mxu1  ;;  %1010 = vmatpush3.bf16.msra.mxu0 %v1007_v51 }
 0x107   :  { %v265_v44 = vadd.f32 %v264_v42, %v86_v0  ;;  %v266_v45 = vpop.f32.mrb[7].mxu1  ;;  %1012 = vmatprep.subr.bf16.mxu0 %v1011_v54 }
 0x108   :  { %v267_v46 = vadd.f32 %v266_v45, %v90_v36  ;;  %487 = vmatprep.mubr.f32.mxu1 %v272_v41  ;;  %v746_v41 = vld [vmem:[%s1389_s8] ss:$0 sm:$0xff]  ;;  %s1077_s8 = scalar_lea.vmem %s725_s22, 256 }
 0x109   :  { %488 = vmatmul.mubr.f32.vlgmr.msra.gmra.mrb[8].mxu1 %v271_v43  ;;  %v275_v48 = vmax.f32 %v265_v44, 0.0  ;;  %p1078_p8 = scmp.ne.s32.totalorder %s725_s22, %s1077_s8  ;;  %p1083_p10 = scmp.lt.s32.totalorder %s1077_s8, %s1077_s8 }
 0x10a   :  { %v276_v47 = vmax.f32 %v267_v46, 0.0  ;;  %1014 = vmatpush3.bf16.msra.mxu0 %v1011_v54  ;;  %1034 = vmatpush3.bf16.msra.mxu1 %v1031_v7 }
 0x10b   :  { %1016 = vmatprep.subr.bf16.mxu0 %v1015_v57  ;;  %1036 = vmatprep.subr.bf16.mxu1 %v1035_v9  ;;  %p1084_p11 = por %p1083_p10, %p1082_p9 }
 0x10c   :  { %492 = vmatprep.mubr.f32.mxu1 %v276_v47 }
 0x10d   :  { %493 = vmatmul.mubr.f32.gmra.mrb[10].mxu1 %v275_v48  ;;  %p1085_p12 = pnand %p1084_p11, %p1078_p8 }
 0x10e   :  { %1018 = vmatpush3.bf16.msra.mxu0 %v1015_v57  ;;  %1038 = vmatpush3.bf16.msra.mxu1 %v1035_v9 }
 0x10f   :  { %1020 = vmatprep.subr.bf16.mxu0 %v1019_v60  ;;  %1040 = vmatprep.subr.bf16.mxu1 %v1039_v12 }
 0x112   :  { %1022 = vmatpush3.bf16.msra.mxu0 %v1019_v60  ;;  %1042 = vmatpush3.bf16.msra.mxu1 %v1039_v12 }
 0x113   :  { %1024 = vmatprep.subr.bf16.mxu0 %v1023_v63  ;;  %1044 = vmatprep.subr.bf16.mxu1 %v1043_v34 }
 0x116   :  { %1026 = vmatpush3.bf16.msra.mxu0 %v1023_v63  ;;  %1046 = vmatpush3.bf16.msra.mxu1 %v1043_v34 }
 0x117   :  { %1028 = vmatprep.subr.bf16.mxu0 %v1027_v3 }
 0x11a   :  { %1030 = vmatpush3.bf16.msra.mxu0 %v1027_v3 }
 0x1d0   :  { %v781_v13 = vpop.f32.mrb[0].mxu0 }
 0x1d1   :  { %v782_v14 = vpop.f32.mrb[1].mxu0 }
 0x1d2   :  { %v783_v15 = vadd.f32 %v782_v14, %v781_v13 }
 0x1d4   :  { %v784_v16 = vpop.f32.mrb[2].mxu0  ;;  %v415_v23 = vadd.f32 %v783_v15, %v744_v20 }
 0x1d5   :  { %v785_v17 = vpop.f32.mrb[3].mxu0 }
 0x1d6   :  { %v786_v19 = vadd.f32 %v785_v17, %v784_v16 }
 0x1d8   :  { %v420_v18 = vadd.f32 %v786_v19, %v744_v20 }
 0x1dc   :  { %v819_v21 = vpop.f32.mrb[8].mxu1 }
 0x1dd   :  { %v820_v22 = vpop.f32.mrb[9].mxu1 }
 0x1de   :  { %v821_v24 = vadd.f32 %v820_v22, %v819_v21 }
 0x1e0   :  { %v490_v25 = vadd.f32 %v821_v24, %v415_v23  ;;  %v822_v26 = vpop.f32.mrb[10].mxu1 }
 0x1e1   :  { %v823_v27 = vpop.f32.mrb[11].mxu1 }
 0x1e2   :  { %v498_v28 = vmax.f32 %v490_v25, 0.0  ;;  %v824_v29 = vadd.f32 %v823_v27, %v822_v26 }
 0x1e4   :  { %v495_v30 = vadd.f32 %v824_v29, %v420_v18  ;;  %885 = vmatprep.mubr.f32.mxu0 %v498_v28 }
 0x1e6   :  { %v499_v31 = vmax.f32 %v495_v30, 0.0 }
 0x1e8   :  { %886 = vmatmul.mubr.f32.vlgmr.msra.gmra.mrb[4].mxu0 %v499_v31 }
 0x2bb   :  { %v887_v0 = vpop.f32.mrb[4].mxu0 }
 0x2bc   :  { %v595_v36 = vadd.f32 %v887_v0, %v745_v35  ;;  %v589_v37 = vpop.f32.mrb[5].mxu0 }
 0x2bd   :  { %v590_v38 = vadd.f32 %v745_v35, %v589_v37 }
 0x2be   :  { %v599_v40 = vmax.f32 %v595_v36, 0.0 }
 0x2bf   :  { %v598_v39 = vmax.f32 %v590_v38, 0.0 }
 0x2c1   :  { %697 = vrot.lane.b32.xlu0 %v598_v39, %s1108_s17  ;;  %904 = vmatprep.mubr.msk.f32.mxu1 %vm615_vm4, %v598_v39 }
 0x2c2   :  { %905 = vmatmul.mubr.msk.f32.vlgmr.msra.gmra.mrb[12].mxu1 %vm615_vm4, %v599_v40 }
 0x2c5   :  { %699 = vrot.lane.b32.xlu0 %v599_v40, %s1108_s17 }
 0x333   :  { %v698_v46 = vpop.permute.xlu0 %697 }
 0x337   :  { %v700_v50 = vpop.permute.xlu0 %699 }
 0x395   :  { %v906_v42 = vpop.f32.mrb[12].mxu1 }
 0x396   :  { %v688_v43 = vpop.f32.mrb[13].mxu1  ;;  %v694_v45 = vadd.f32 %v906_v42, %v746_v41 }
 0x397   :  { %v689_v44 = vadd.f32 %v746_v41, %v688_v43 }
 0x399   :  { %705 = vrot.lane.b32.xlu1 %v689_v44, %s1109_s6 }
 0x39d   :  { %707 = vrot.lane.b32.xlu1 %v694_v45, %s1109_s6 }
 0x40b   :  { %v706_v47 = vpop.permute.xlu1 %705 }
 0x40c   :  { %v712_v48 = vsel %vm711_vm5, %v698_v46, %v706_v47 }
 0x40d   :  { %v715_v49 = vsel %vm714_vm6, %v712_v48, 0.0 }
 0x40e   :  { %717 = vst [vmem:[#allocation5] sm:$0xff] %v715_v49 }
 0x40f   :  { %v708_v51 = vpop.permute.xlu1 %707 }
 0x410   :  { %v713_v52 = vsel %vm711_vm5, %v700_v50, %v708_v51 }
 0x411   :  { %v716_v53 = vsel %vm714_vm6, %v713_v52, 0.0 }
 0x412   :  { %718 = vst [vmem:[#allocation5 + $0x8] sm:$0xff] %v716_v53 }
 0x413   :  { %1088 = shalt.err (!%p1085_p12)
}
 0x414   :  { %s1089_s24 = scalar_lea.hbm %s1390_s9, 256 }
 0x415   :  { %p1090_p13 = scmp.ne.s32.totalorder %s1390_s9, %s1089_s24  ;;  %p1093_p0 = scmp.lt.u32.totalorder %s1089_s24, %s1390_s9 }
 0x417   :  { %p1095_p1 = pnand %p1093_p0, %p1090_p13 }
 0x419   :  { %1098 = shalt.err (!%p1095_p1)
}
 0x41a   :  { %730 = dma.vmem_to_hbm [thread:$0]  %s725_s22, 256, %s1390_s9, [#allocation4], %s1104_s19, %s1104_s19, %s1105_s20  }
 0x41b   :  { %1101 = dma.done.wait [#allocation4], 256  }
 0x41c   :  { %1102 = vsyncadd [#allocation4], 4294967040 }
 0x41d   :  { %734 = vsyncpa [#allocation3], 1 }
 0x41e   :  { %735 = vsyncpa [#allocation4], 1 }

</bundles_post_ra>
